<compile_context>
chip_gen: v6e
topology: v6e:2x2x1
jax: 0.10.0
libtpu: 0.0.40
codegen_flags: <defaults>
</compile_context>

<pallas_src>
import jax
import jax.numpy as jnp
from jax.experimental import pallas as pl
from jax.experimental.pallas import tpu as pltpu

_EPS = 1e-8  # torch.cosine_similarity default eps


def _cdiv(a, b):
    return -(-a // b)


def _ceil_to(a, b):
    return _cdiv(a, b) * b


def _cos_attention_kernel(title_ref, attr_ref, out_ref):
    # title_ref: (TB, TS, H), attr_ref: (TB, 1, H), out_ref: (TB, TS, H)
    t = title_ref[...]                                   # native dtype
    a = attr_ref[...]                                    # native dtype

    # f32-promoted reductions (short live range; no f32 tile kept until the
    # final store). For f32 inputs the casts are no-ops.
    tf = t.astype(jnp.float32)                           # (TB, TS, H)
    af = a.astype(jnp.float32)                           # (TB, 1, H)

    dot = jnp.sum(tf * af, axis=-1, keepdims=True)       # (TB, TS, 1)
    ss_t = jnp.sum(tf * tf, axis=-1, keepdims=True)      # (TB, TS, 1)
    ss_a = jnp.sum(af * af, axis=-1, keepdims=True)      # (TB, 1, 1)

    # ATen cosine_similarity: dot / sqrt(max(||t||^2 * ||a||^2, eps^2)).
    # rsqrt runs on the EUP (its own VLIW slot) -> no divide on the VALU path.
    inv_denom = jax.lax.rsqrt(jnp.maximum(ss_t * ss_a, _EPS * _EPS))
    cos_sim = (dot * inv_denom).astype(t.dtype)          # (TB, TS, 1)

    # Final scale in the native dtype (keeps bf16 tiles bf16 end-to-end).
    out_ref[...] = (t * cos_sim).astype(out_ref.dtype)


def _vmem_budget_bytes():
    """Per-generation scoped-VMEM budget.

    ~48 MiB on v7x (64 MiB physical), 64 MiB on v5e/v6e (128 MiB physical).
    Falls back to the v7x-safe 48 MiB if the hardware query is unavailable.
    """
    capacity = 64 << 20  # conservative (v7x-sized) fallback
    try:
        info = pltpu.get_tpu_info()
        cap = getattr(info, "vmem_capacity_bytes", None)
        if cap:
            capacity = int(cap)
    except Exception:  # e.g. interpret mode / no TPU visible at trace time
        pass
    return min(64 << 20, (capacity * 3) // 4)


def _choose_tiles(B, S, H, dtype, vmem_budget):
    """Pick (TB, TS) so one (padded) title tile is ~4-8 MiB and peak VMEM
    (2x double-buffered title-in + out tiles, plus the f32 upcast temporary
    for sub-32-bit inputs) stays inside `vmem_budget`."""
    itemsize = jnp.dtype(dtype).itemsize
    packing = max(1, 4 // itemsize)   # elements per 32-bit sublane slot
    sub = 8 * packing                 # sublane granule for this dtype
    h_pad = _ceil_to(H, 128)          # lanes always pad to 128 in VMEM

    # Peak VMEM per byte of padded title tile:
    #   2 buffers x (title in + out) = 4x, plus f32 temp if sub-32-bit input.
    f32_factor = 0 if itemsize >= 4 else (4 // itemsize)
    per_tile_budget = vmem_budget // (4 + f32_factor)
    target = min(8 << 20, per_tile_budget)   # aim for 4-8 MiB tiles

    def tile_bytes(tb, ts):
        return tb * _ceil_to(ts, sub) * h_pad * itemsize

    row_bytes = tile_bytes(1, S)
    if row_bytes <= target:
        # Full (S, H) rows per step; pack as many batch rows as fit the target.
        ts = S
        tb = max(1, min(B, target // row_bytes))
    else:
        # Tile the sequence axis (the reduction is over H only, so S-tiling is
        # embarrassingly parallel). Legal for any H: the lane dim is always the
        # full H; ts just has to be a multiple of the sublane granule.
        tb = 1
        ts = max(sub, ((target // (h_pad * itemsize)) // sub) * sub)
        ts = min(ts, S)

    # Megacore: v7x has 2 TensorCores; make sure the parallel grid has >=2
    # steps whenever the problem can be split (neutral on v5e/v6e).
    if _cdiv(B, tb) * _cdiv(S, ts) < 2:
        if B >= 2:
            tb = _cdiv(B, 2)
        elif S >= 2 * sub:
            ts = _ceil_to(_cdiv(S, 2), sub)
    return tb, ts


def cos_attention(title_output, attr_output):
    """title_output: (B, S, H), attr_output: (B, H) -> (B, S, H)."""
    B, S, H = title_output.shape
    assert attr_output.shape == (B, H)

    vmem_budget = _vmem_budget_bytes()
    tb, ts = _choose_tiles(B, S, H, title_output.dtype, vmem_budget)
    grid = (pl.cdiv(B, tb), pl.cdiv(S, ts))

    # Present attr as (B, 1, H): the block's last two dims (1, H) are full
    # dims, so tb stays an unconstrained leading block dim.
    attr3 = attr_output[:, None, :]

    return pl.pallas_call(
        _cos_attention_kernel,
        out_shape=jax.ShapeDtypeStruct((B, S, H), title_output.dtype),
        grid_spec=pltpu.PrefetchScalarGridSpec(
            num_scalar_prefetch=0,
            grid=grid,
            in_specs=[
                pl.BlockSpec((tb, ts, H), lambda b, s: (b, s, 0)),
                # attr stays resident across the sequence-tile axis.
                pl.BlockSpec((tb, 1, H), lambda b, s: (b, 0, 0)),
            ],
            out_specs=pl.BlockSpec((tb, ts, H), lambda b, s: (b, s, 0)),
        ),
        compiler_params=pltpu.CompilerParams(
            dimension_semantics=("parallel", "parallel"),
            vmem_limit_bytes=vmem_budget,
        ),
    )(title_output, attr3)


def _reference(title_output, attr_output):
    # Plain-JAX mirror of torch.cosine_similarity (ATen clamps the product of
    # squared norms) followed by the elementwise scale.
    a = attr_output[:, None, :]                                     # (B, 1, H)
    dot = jnp.sum(a * title_output, axis=-1)                        # (B, S)
    ss_t = jnp.sum(title_output * title_output, axis=-1)            # (B, S)
    ss_a = jnp.sum(a * a, axis=-1)                                  # (B, 1)
    cos = dot / jnp.sqrt(jnp.maximum(ss_t * ss_a, _EPS * _EPS))
    return title_output * cos[..., None]


if __name__ == "__main__":
    key = jax.random.PRNGKey(0)
    k1, k2 = jax.random.split(key)

    B, S, H = 2, 8, 32
    title = jax.random.normal(k1, (B, S, H), dtype=jnp.float32)
    attr = jax.random.normal(k2, (B, H), dtype=jnp.float32)

    out = jax.block_until_ready(cos_attention(title, attr))

    ref = _reference(title, attr)
    assert out.shape == (B, S, H)
    assert jnp.allclose(out, ref, atol=1e-5, rtol=1e-5)

    print("KERNEL_OK")
</pallas_src>

<mosaic_0001>
module attributes {stable_mosaic.version = 11 : i64} {
  func.func @_cos_attention_kernel(%arg0: i32, %arg1: i32, %arg2: memref<1x8x32xf32, #tpu.memory_space<vmem>>, %arg3: memref<1x1x32xf32, #tpu.memory_space<vmem>>, %arg4: memref<1x8x32xf32, #tpu.memory_space<vmem>>) attributes {dimension_semantics = [#tpu.dimension_semantics<parallel>, #tpu.dimension_semantics<parallel>], iteration_bounds = array<i64: 2, 1>, scalar_prefetch = 0 : i64, scratch_operands = 0 : i64, tpu.core_type = #tpu.core_type<tc>, window_params = [{transform_indices = @transform_0, window_bounds = array<i64: 1, 8, 32>}, {transform_indices = @transform_1, window_bounds = array<i64: 1, 1, 32>}, {transform_indices = @transform_2, window_bounds = array<i64: 1, 8, 32>}]} {
    %c0 = arith.constant 0 : index
    %c0_0 = arith.constant 0 : index
    %c0_1 = arith.constant 0 : index
    %0 = vector.load %arg2[%c0, %c0_0, %c0_1] : memref<1x8x32xf32, #tpu.memory_space<vmem>>, vector<1x8x32xf32>
    %c0_2 = arith.constant 0 : index
    %c0_3 = arith.constant 0 : index
    %c0_4 = arith.constant 0 : index
    %1 = vector.load %arg3[%c0_2, %c0_3, %c0_4] : memref<1x1x32xf32, #tpu.memory_space<vmem>>, vector<1x1x32xf32>
    %2 = vector.broadcast %1 : vector<1x1x32xf32> to vector<1x8x32xf32>
    %3 = arith.mulf %0, %2 : vector<1x8x32xf32>
    %cst = arith.constant dense<0.000000e+00> : vector<1x8xf32>
    %4 = vector.multi_reduction <add>, %3, %cst [2] : vector<1x8x32xf32> to vector<1x8xf32>
    %5 = vector.shape_cast %4 : vector<1x8xf32> to vector<1x8x1xf32>
    %6 = arith.mulf %0, %0 : vector<1x8x32xf32>
    %cst_5 = arith.constant dense<0.000000e+00> : vector<1x8xf32>
    %7 = vector.multi_reduction <add>, %6, %cst_5 [2] : vector<1x8x32xf32> to vector<1x8xf32>
    %8 = vector.shape_cast %7 : vector<1x8xf32> to vector<1x8x1xf32>
    %9 = arith.mulf %1, %1 : vector<1x1x32xf32>
    %cst_6 = arith.constant dense<0.000000e+00> : vector<1x1xf32>
    %10 = vector.multi_reduction <add>, %9, %cst_6 [2] : vector<1x1x32xf32> to vector<1x1xf32>
    %11 = vector.shape_cast %10 : vector<1x1xf32> to vector<1x1x1xf32>
    %12 = vector.broadcast %11 : vector<1x1x1xf32> to vector<1x8x1xf32>
    %13 = arith.mulf %8, %12 : vector<1x8x1xf32>
    %cst_7 = arith.constant 1.000000e-16 : f32
    %14 = vector.broadcast %cst_7 : f32 to vector<1x8x1xf32>
    %15 = arith.maximumf %13, %14 : vector<1x8x1xf32>
    %16 = math.rsqrt %15 : vector<1x8x1xf32>
    %17 = arith.mulf %5, %16 : vector<1x8x1xf32>
    %18 = vector.broadcast %17 : vector<1x8x1xf32> to vector<1x8x32xf32>
    %19 = arith.mulf %0, %18 : vector<1x8x32xf32>
    %c0_8 = arith.constant 0 : index
    %c0_9 = arith.constant 0 : index
    %c0_10 = arith.constant 0 : index
    %20 = vector.load %arg4[%c0_8, %c0_9, %c0_10] : memref<1x8x32xf32, #tpu.memory_space<vmem>>, vector<1x8x32xf32>
    tpu.vector_store %arg4[%c0_8, %c0_9, %c0_10], %19 {strides = array<i32>} : memref<1x8x32xf32, #tpu.memory_space<vmem>>, vector<1x8x32xf32>,
    return
  }
  func.func @transform_0(%arg0: i32, %arg1: i32) -> (i32, i32, i32) {
    %c0_i32 = arith.constant 0 : i32
    %c0_i32_0 = arith.constant 0 : i32
    return %arg0, %arg1, %c0_i32 : i32, i32, i32
  }
  func.func @transform_1(%arg0: i32, %arg1: i32) -> (i32, i32, i32) {
    %c0_i32 = arith.constant 0 : i32
    %c0_i32_0 = arith.constant 0 : i32
    %c0_i32_1 = arith.constant 0 : i32
    return %arg0, %c0_i32, %c0_i32_0 : i32, i32, i32
  }
  func.func @transform_2(%arg0: i32, %arg1: i32) -> (i32, i32, i32) {
    %c0_i32 = arith.constant 0 : i32
    %c0_i32_0 = arith.constant 0 : i32
    return %arg0, %arg1, %c0_i32 : i32, i32, i32
  }
}

</mosaic_0001>

<bundles_post_ra>
// kernel: tpu_custom_call.1
= control target key start
LH: loop header
LB: loop body
LE: loop exit
PB: predicated region body
PF: predicated region fallthrough
CT: control target
= control target key end

     0   :  { %7 = vsyncpa [#allocation3], 0  ;;  %s771_s0 = inlined_call_operand.hbm [shape: f32[2,8,32], index: 0, kind: input, shape index: {}]   ;;  %s772_s1 = inlined_call_operand.hbm [shape: f32[2,1,32], index: 1, kind: input, shape index: {}]   ;;  %s773_s2 = inlined_call_operand.hbm [shape: f32[2,8,32], index: 2, kind: output, shape index: {}]  }
   0x1   :  { %9 = vsyncpa [#allocation3 + $0x1], 0 }
   0x2   :  { %10 = vsyncpa [#allocation6], 0 }
   0x3   :  { %12 = vsyncpa [#allocation6 + $0x1], 0 }
   0x4   :  { %13 = vsyncpa [#allocation4], 0 }
   0x5   :  { %15 = vsyncpa [#allocation4 + $0x1], 0  ;;  %s600_s9 = smov 0   ;;  %s602_s10 = smov 0  }
   0x6   :  { %s604_s11 = smov 0   ;;  %s606_s12 = smov 0  }
   0x7   :  { %s608_s13 = smov 0   ;;  %s610_s14 = smov 0  }
   0x8 LB: > { %s357_s15 = sadd.s32 4294967295, %s580_s14   ;;  %s358_s16 = sadd.s32 4294967294, %s580_s14   ;;  %s580_s14 = sphi %s610_s14, %s21_s14   ;;  %s576_s13 = sphi %s608_s13, %s785_s13   ;;  %s572_s12 = sphi %s606_s12, %s784_s12   ;;  %s568_s11 = sphi %s604_s11, %s783_s11   ;;  %s564_s10 = sphi %s602_s10, %s782_s10   ;;  %s560_s9 = sphi %s600_s9, %s781_s9  }
   0x9   : > { %s33_s17 = sadd.s32 1, %s576_s13  ;;  %s42_s18 = sadd.s32 1, %s568_s11 }
   0xa   : > { %p35_p0 = scmp.ge.s32.totalorder %s33_s17, 2  ;;  %p49_p1 = scmp.ne.s32.totalorder %s568_s11, %s564_s10 }
   0xb   : > { %p50_p2 = scmp.eq.s32.totalorder %s580_s14, 0  ;;  %p55_p3 = scmp.ne.s32.totalorder %s564_s10, %s560_s9 }
   0xc   : > { %s787_s17 = smov (%p35_p0, %s33_s17), 0  ;;  %p56_p5 = scmp.eq.s32.totalorder %s357_s15, 0 }
   0xd   : > { %p641_p4 = por %p50_p2, %p49_p1  ;;  %s37_s20 = ssub.s32 %s576_s13, %s787_s17 }
   0xe   : > { %p107_p6 = scmp.eq.s32.totalorder %s357_s15, 1  ;;  %p40_p7 = scmp.eq.s32.totalorder %s37_s20, 0 }
   0xf   : > { %p647_p8 = por %p56_p5, %p55_p3  ;;  %p113_p10 = scmp.eq.s32.totalorder %s358_s16, 1 }
  0x10   : > { %p651_p9 = por %p107_p6, %p49_p1  ;;  %p388_p13 = scmp.lt.s32.totalorder %s580_s14, 2 }
  0x11   : > { %s656_s23 = scalar_select %p40_p7, %s568_s11, %s42_s18  }
  0x12   : > { %p658_p11 = por %p113_p10, %p55_p3  ;;  %s665_s25 = sand.u32 1, %s568_s11  }
  0x13   : > { %s361_s26 = sshll.u32 %s665_s25, 3  ;;  %s362_s27 = sshll.u32 %s576_s13, 7 }
  0x14   : > { %s143_s30 = scalar_lea.hbm %s771_s0, %s362_s27  ;;  %s137_s3 = scalar_lea.vmem [#allocation2], %s361_s26 }
  0x15   : > { %s145_s4 = sshll.u32 %s137_s3, 4  ;;  %p674_p0 = pnand %p388_p13, %p641_p4  ;;  %s146_s4 = int_to_ptr.vmem [resolvable:$true] %s145_s4 }
  0x16   : > { %p364_p1 = scmp.ge.s32.totalorder %s580_s14, 1  ;;  %p167_p2 = scmp.lt.s32.totalorder %s580_s14, 3 }
  0x17   : > { %s134_s6 = scalar_lea.sflag [#allocation3], %s665_s25  ;;  %p442_p3 = pneg %p674_p0 }
  0x18   : > { %s453_s7 = scalar_lea.vmem %s146_s4, 128  ;;  %s582_s8 = smov [#allocation2]  }
  0x19   : > { %p454_p5 = scmp.ne.s32.totalorder %s146_s4, %s453_s7  ;;  %s458_s15 = sshll.u32 %s582_s8, 4  ;;  %s459_s15 = int_to_ptr.vmem [resolvable:$false] %s458_s15 }
  0x1a   : > { %s460_s16 = scalar_lea.vmem %s459_s15, 256  ;;  %p461_p4 = scmp.lt.s32.totalorder %s146_s4, %s459_s15 }
  0x1b   : > { %p456_p6 = pnand %p454_p5, %p442_p3  ;;  %p462_p10 = scmp.lt.s32.totalorder %s460_s16, %s453_s7 }
  0x1d   : > { %p457_p7 = pneg %p456_p6  ;;  %p463_p13 = por %p462_p10, %p461_p4 }
  0x1f   : > { %p464_p12 = pnand %p463_p13, %p457_p7 }
  0x21   : > { %467 = shalt.err (!%p464_p12)
}
  0x22   : > { %380 = dma.hbm_to_vmem [thread:$0]  (!%p674_p0), %s143_s30, 128, %s146_s4, %s134_s6  }
  0x23   : > { %p692_p5 = pnand %p364_p1, %p167_p2  ;;  %s363_s19 = sshll.u32 %s576_s13, 4 }
  0x24   : > { %s155_s20 = scalar_lea.vmem [#allocation5], %s665_s25  ;;  %s160_s29 = scalar_lea.hbm %s772_s1, %s363_s19 }
  0x25   : > { %s162_s26 = sshll.u32 %s155_s20, 4  ;;  %s153_s3 = scalar_lea.sflag [#allocation6], %s665_s25  ;;  %s163_s26 = int_to_ptr.vmem [resolvable:$true] %s162_s26 }
  0x26   : > { %s481_s7 = scalar_lea.vmem %s163_s26, 16  ;;  %s583_s30 = smov [#allocation5]  }
  0x27   : > { %p482_p12 = scmp.ne.s32.totalorder %s163_s26, %s481_s7  ;;  %s486_s4 = sshll.u32 %s583_s30, 4  ;;  %s487_s4 = int_to_ptr.vmem [resolvable:$false] %s486_s4 }
  0x28   : > { %s488_s6 = scalar_lea.vmem %s487_s4, 32  ;;  %p489_p1 = scmp.lt.s32.totalorder %s163_s26, %s487_s4 }
  0x29   : > { %p484_p6 = pnand %p482_p12, %p442_p3  ;;  %p490_p2 = scmp.lt.s32.totalorder %s488_s6, %s481_s7 }
  0x2b   : > { %p485_p7 = pneg %p484_p6  ;;  %p491_p4 = por %p490_p2, %p489_p1 }
  0x2d   : > { %p492_p10 = pnand %p491_p4, %p485_p7 }
  0x2f   : > { %495 = shalt.err (!%p492_p10)
}
  0x30   : > { %383 = dma.hbm_to_vmem [thread:$0]  (!%p674_p0), %s160_s29, 16, %s163_s26, %s153_s3  }
  0x31   : > { %171 = sbr.rel (%p692_p5) target bundleno = 238 (0xee), region = 28  ;;  %s710_s25 = sand.u32 (!%p692_p5), 1, %s564_s10  }
  0x32   : > { %s365_s8 = sshll.u32 (!%p692_p5), %s710_s25, 3  ;;  %s174_s15 = scalar_lea.sflag (!%p692_p5), [#allocation3], %s710_s25 }
  0x33   : > { %s177_s16 = scalar_lea.vmem (!%p692_p5), [#allocation2], %s365_s8 }
  0x36   : > { %547 = dma.done.wait (%p647_p8), %s174_s15, 128  }
  0x37   : > { %549 = vsyncadd (%p647_p8), %s174_s15, 4294967168  ;;  %s183_s5 = scalar_lea.sflag [#allocation6], %s710_s25  ;;  %s185_s18 = scalar_lea.vmem [#allocation5], %s710_s25 }
  0x38   : > { %551 = dma.done.wait (%p647_p8), %s183_s5, 16  }
  0x39   : > { %553 = vsyncadd (%p647_p8), %s183_s5, 4294967280  ;;  %v213_v0 = vlaneseq  ;;  %v211_v3 = vld [vmem:[%s185_s18] sm:$0x1]  ;;  %vm228_vm0 = vcmask 253952   ;;  %vm219_vm1 = vcmask 261120   ;;  %s368_s21 = sshll.u32 %s572_s12, 7 }
  0x3a   : > { %v210_v4 = vld [vmem:[%s177_s16] sm:$0xff]  ;;  %v227_v5 = vmul.f32 %v211_v3, %v211_v3  ;;  %s209_s19 = scalar_lea.vmem [#allocation7], %s365_s8  ;;  %s255_s28 = scalar_lea.hbm %s773_s2, %s368_s21 }
  0x3b   : > { %v214_v1 = vshrl.u32 %v213_v0, 7  ;;  %v223_v6 = vmul.f32 %v210_v4, %v210_v4  ;;  %s257_s20 = sshll.u32 %s209_s19, 4  ;;  %s243_s29 = scalar_lea.sflag [#allocation4], %s710_s25  ;;  %s258_s20 = int_to_ptr.vmem [resolvable:$true] %s257_s20 }
  0x3c   : > { %v229_v8 = vsel %vm228_vm0, %v227_v5, 0.0  ;;  %s496_s3 = scalar_lea.vmem %s258_s20, 128  ;;  %s584_s7 = smov [#allocation7]  }
  0x3d   : > { %v215_v2 = vsub.s32 0, %v214_v1  ;;  %230 = vadd.xlane.f32.xlu0 %v229_v8  ;;  %v224_v10 = vsel %vm219_vm1, %v223_v6, 0.0  ;;  %p497_p8 = scmp.ne.s32.totalorder %s258_s20, %s496_s3  ;;  %s500_s12 = sshll.u32 %s584_s7, 4  ;;  %s501_s12 = int_to_ptr.vmem [resolvable:$false] %s500_s12 }
  0x3e   : > { %s502_s30 = scalar_lea.vmem %s501_s12, 256  ;;  %p503_p13 = scmp.lt.s32.totalorder %s258_s20, %s501_s12 }
  0x3f   : > { %v216_v7 = vrot.slane %v211_v3, %v215_v2  ;;  %p498_p0 = pnand %p497_p8, %p651_p9  ;;  %p504_p5 = scmp.lt.s32.totalorder %s502_s30, %s496_s3 }
  0x41   : > { %v218_v9 = vmul.f32 %v216_v7, %v210_v4  ;;  %225 = vadd.xlane.f32.xlu0 %v224_v10  ;;  %p499_p3 = pneg %p498_p0  ;;  %p505_p12 = por %p504_p5, %p503_p13 }
  0x43   : > { %v220_v11 = vsel %vm219_vm1, %v218_v9, 0.0  ;;  %p506_p6 = pnand %p505_p12, %p499_p3 }
  0x44   : > { %221 = vadd.xlane.f32.xlu1 %v220_v11 }
  0xc6   : > { %v231_v12 = vpop.xlane.xlu0 %230 }
  0xc7   : > { %v235_v13 = vrot.slane %v231_v12, %v215_v2 }
  0xca   : > { %v226_v14 = vpop.xlane.xlu0 %225 }
  0xcb   : > { %v236_v15 = vmul.f32 %v235_v13, %v226_v14 }
  0xcd   : > { %v237_v16 = vmax.f32 %v236_v15, 1e-16  ;;  %v222_v17 = vpop.xlane.xlu1 %221 }
  0xcf   : > { %438 = vrsqrt.f32 %v237_v16 }
  0xdc   : > { %v439_v18 = vpop.eup %438 }
  0xdd   : > { %v239_v19 = vmul.f32 %v439_v18, %v222_v17 }
  0xdf   : > { %v240_v20 = vmul.f32 %v239_v19, %v210_v4 }
  0xe1   : > { %241 = vst.msk [vmem:[%s209_s19] sm:$0xff] %vm219_vm1, %v240_v20 }
  0xe2   : > { %509 = shalt.err (!%p506_p6)
}
  0xe3   : > { %s510_s4 = scalar_lea.hbm %s255_s28, 128  ;;  %s514_s8 = scalar_lea.hbm %s773_s2, 256 }
  0xe4   : > { %p511_p7 = scmp.ne.s32.totalorder %s255_s28, %s510_s4  ;;  %p515_p4 = scmp.lt.s32.totalorder %s255_s28, %s773_s2 }
  0xe5   : > { %p516_p10 = scmp.lt.s32.totalorder %s514_s8, %s510_s4 }
  0xe6   : > { %p512_p1 = pnand %p511_p7, %p651_p9 }
  0xe7   : > { %p517_p8 = por %p516_p10, %p515_p4 }
  0xe8   : > { %p513_p2 = pneg %p512_p1 }
  0xea   : > { %p518_p0 = pnand %p517_p8, %p513_p2 }
  0xec   : > { %521 = shalt.err (!%p518_p0)
}
  0xed   : > { %375 = dma.vmem_to_hbm [thread:$0]  (%p651_p9), %s258_s20, 128, %s255_s28, %s243_s29  }
  0xee PF: > { %s269_s5 = sand.u32 1, %s560_s9   ;;  %p780_p3 = scmp.ge.s32.totalorder %s580_s14, 2 }
  0xef   : > { %s270_s18 = scalar_lea.sflag [#allocation4], %s269_s5 }
  0xf0   : > { %p385_p13 = pnand %p780_p3, %p658_p11 }
  0xf2   : > { %p386_p5 = pneg %p385_p13 }
  0xf4   : > { %555 = dma.done.wait (%p386_p5), %s270_s18, 128  }
  0xf5   : > { %557 = vsyncadd (%p386_p5), %s270_s18, 4294967168  ;;  %s21_s14 = sadd.s32 1, %s580_s14   ;;  %s781_s9 = smov %s564_s10 }
  0xf6   : > { %p18_p12 = scmp.ge.s32.totalorder %s21_s14, 4   ;;  %s782_s10 = smov %s568_s11 }
  0xf7   : > { %s783_s11 = smov %s656_s23  ;;  %s784_s12 = smov %s576_s13 }
  0xf8   : > { %s785_s13 = smov %s787_s17  ;;  %20 = sbr.rel (!%p18_p12) target bundleno = 8 (0x8), region = 86 }
  0xfd   :  { %275 = vsyncpa [#allocation3], 1 }
  0xfe   :  { %277 = vsyncpa [#allocation3 + $0x1], 1 }
  0xff   :  { %278 = vsyncpa [#allocation6], 1 }
 0x100   :  { %280 = vsyncpa [#allocation6 + $0x1], 1 }
 0x101   :  { %281 = vsyncpa [#allocation4], 1 }
 0x102   :  { %283 = vsyncpa [#allocation4 + $0x1], 1 }

</bundles_post_ra>
